<compile_context>
chip_gen: v7x
topology: tpu7x:2x2x1
jax: 0.10.0
libtpu: 0.0.40
codegen_flags: <defaults>
</compile_context>

<pallas_src>
import jax
import jax.numpy as jnp
from jax import lax
from jax.experimental import pallas as pl
from jax.experimental.pallas import tpu as pltpu

HIDDEN_DIM = 128

VMEM_LIMIT_BYTES = 32 * 1024 * 1024   # explicit scoped-VMEM request (safe on v5e/v6e/v7x)
VMEM_TILE_BUDGET = 24 * 1024 * 1024   # target per-call footprint, leaves compiler headroom


def _round_up(x, m):
    return (x + m - 1) // m * m


def _pick_tile(B, S, x_itemsize, w_itemsize, tile_m):
    """Choose (tm rows per grid step, number of grid steps)."""
    H = HIDDEN_DIM
    S_pad = _round_up(S, 128)          # x tile is lane-padded to 128 lanes in VMEM

    def footprint(t):
        return (2 * t * S_pad * x_itemsize                      # double-buffered x tile
                + 3 * t * H * 4                                  # f32 hidden temporaries
                + 2 * t * 4                                      # double-buffered output row
                + 2 * (S_pad * H + H * H + 3 * H) * w_itemsize)  # resident weights/biases

    if B <= 256:
        # Tiny batch: one tile; per-step overhead (~0.35us) dominates, splitting
        # across TCs would only add overhead.
        return _round_up(B, 8), 1

    nt = max(2, pl.cdiv(B, tile_m))    # >= 2 steps so both v7x TensorCores get work
    nt += nt % 2                       # even step count -> balanced megacore split
    tm = _round_up(pl.cdiv(B, nt), 128)  # 128-multiple -> full unmasked lane-dense stores
    while tm > 128 and footprint(tm) > VMEM_TILE_BUDGET:
        tm = _round_up(tm // 2, 128)
    return tm, pl.cdiv(B, tm)


def critic_kernel(x_ref, w1_ref, b1_ref, w2_ref, b2_ref, w3_ref, b3_ref, o_ref):
    # x: (TM, S); w1: (S, H); w2: (H, H); w3: (1, H); b1/b2: (1, H) f32;
    # b3: (1, 1) scalar in SMEM.  o: (1, TM) lane-dense row.
    # All matmuls accumulate in f32; x is cast to the weight dtype in-kernel
    # (no extra HBM pass in the bf16-weight configuration).
    x = x_ref[...].astype(w1_ref.dtype)

    # shared_network layer 1: Linear + ReLU
    h = jnp.dot(x, w1_ref[...], preferred_element_type=jnp.float32) + b1_ref[...]
    h = jnp.maximum(h, 0.0)

    # shared_network layer 2: Linear + ReLU
    h = (jnp.dot(h.astype(w2_ref.dtype), w2_ref[...],
                 preferred_element_type=jnp.float32) + b2_ref[...])
    h = jnp.maximum(h, 0.0)

    # Critic head fc_out = Linear(H, 1), produced directly as a lane-dense
    # (1, TM) row: contract w3 (1, H) with h (TM, H) on their last dims
    # (the standard q @ k^T pattern), so the per-step output store is a
    # contiguous row instead of a masked (TM, 1) column.
    v = lax.dot_general(
        w3_ref[...], h.astype(w3_ref.dtype),
        dimension_numbers=(((1,), (1,)), ((), ())),
        preferred_element_type=jnp.float32)                     # (1, TM)
    o_ref[...] = (v + b3_ref[0, 0]).astype(o_ref.dtype)


def critic_forward(x, params, *, tile_m=2048, param_dtype=None):
    """params = (w1, b1, w2, b2, w3_row, b3):
       w1:(S,H)  w2:(H,H)  w3_row:(1,H)  b1,b2:(1,H)  b3:(1,1).

    param_dtype (e.g. jnp.bfloat16) narrows only the weights; x keeps the
    caller's dtype and is cast in-kernel (recommended on v5e where f32 MXU
    operands are emulated).  Biases / accumulation stay f32.
    """
    w1, b1, w2, b2, w3, b3 = params
    B, S = x.shape
    H = w1.shape[1]

    if param_dtype is not None:
        w1 = w1.astype(param_dtype)
        w2 = w2.astype(param_dtype)
        w3 = w3.astype(param_dtype)

    tm, nt = _pick_tile(B, S, x.dtype.itemsize, w1.dtype.itemsize, tile_m)
    total = nt * tm                      # output row length (>= B; extra sliced off)
    grid = (nt,)

    flops = 2 * B * (S * H + H * H + H)
    bytes_accessed = (x.size * x.dtype.itemsize
                      + w1.size * w1.dtype.itemsize
                      + w2.size * w2.dtype.itemsize
                      + w3.size * w3.dtype.itemsize
                      + (b1.size + b2.size + b3.size) * 4
                      + B * 4)

    out = pl.pallas_call(
        critic_kernel,
        out_shape=jax.ShapeDtypeStruct((1, total), jnp.float32),
        grid=grid,
        in_specs=[
            # x: the only streamed operand.  (If profiling ever shows exposed
            # DMA at small tm, add pipeline_mode=pl.Buffered(3) here.)
            pl.BlockSpec((tm, S), lambda i: (i, 0)),
            pl.BlockSpec((S, H), lambda i: (0, 0)),              # w1: VMEM-resident
            pl.BlockSpec((1, H), lambda i: (0, 0)),              # b1: VMEM-resident
            pl.BlockSpec((H, H), lambda i: (0, 0)),              # w2: VMEM-resident
            pl.BlockSpec((1, H), lambda i: (0, 0)),              # b2: VMEM-resident
            pl.BlockSpec((1, H), lambda i: (0, 0)),              # w3 row: resident
            pl.BlockSpec(memory_space=pltpu.MemorySpace.SMEM),   # b3 scalar
        ],
        # Lane-dense output: step i writes lanes [i*tm, (i+1)*tm) of one row.
        out_specs=pl.BlockSpec((1, tm), lambda i: (0, i)),
        compiler_params=pltpu.CompilerParams(
            dimension_semantics=("parallel",),
            vmem_limit_bytes=VMEM_LIMIT_BYTES),
        cost_estimate=pl.CostEstimate(
            flops=int(flops), transcendentals=0,
            bytes_accessed=int(bytes_accessed)),
    )(x, w1, b1, w2, b2, w3, b3)

    return out[0, :B][:, None]


def init_linear(key, fan_in, fan_out):
    """PyTorch nn.Linear default init: U(-1/sqrt(fan_in), 1/sqrt(fan_in)).
    Returned weight is (fan_in, fan_out) = W.T relative to torch layout."""
    kw, kb = jax.random.split(key)
    bound = 1.0 / jnp.sqrt(jnp.float32(fan_in))
    w = jax.random.uniform(kw, (fan_in, fan_out), jnp.float32, -bound, bound)
    b = jax.random.uniform(kb, (1, fan_out), jnp.float32, -bound, bound)
    return w, b


def reference_forward(x, params):
    w1, b1, w2, b2, w3, b3 = params    # w3 is the (1, H) row form
    h = jnp.maximum(x @ w1 + b1, 0.0)
    h = jnp.maximum(h @ w2 + b2, 0.0)
    return jnp.sum(h * w3, axis=-1, keepdims=True) + b3


if __name__ == "__main__":
    key = jax.random.PRNGKey(0)
    k_x, k1, k2, k3, k_x2 = jax.random.split(key, 5)

    batch = 8
    state_dim = 32

    x = jax.random.normal(k_x, (batch, state_dim), jnp.float32)

    w1, b1 = init_linear(k1, state_dim, HIDDEN_DIM)   # shared layer 1
    w2, b2 = init_linear(k2, HIDDEN_DIM, HIDDEN_DIM)  # shared layer 2
    w3, b3 = init_linear(k3, HIDDEN_DIM, 1)           # fc_out
    params = (w1, b1, w2, b2, w3.T, b3)               # head weight as (1, H) row

    ref = reference_forward(x, params)

    # f32 path: faithful to the PyTorch module's numerics.
    out = jax.block_until_ready(critic_forward(x, params))
    assert out.shape == (batch, 1)
    assert jnp.allclose(out, ref, atol=1e-3, rtol=1e-3)

    # bf16-weight path (x stays f32 in HBM; cast to bf16 happens in-kernel so
    # HBM traffic is unchanged while the MXU gets bf16 operands — the v5e config).
    out_bf16 = jax.block_until_ready(
        critic_forward(x, params, param_dtype=jnp.bfloat16))
    assert out_bf16.shape == (batch, 1)
    assert jnp.allclose(out_bf16, ref, atol=5e-2, rtol=5e-2)

    # Multi-tile / ragged-batch path: grid > 1, lane-dense output rows, and a
    # Pallas boundary block instead of a wrapper-side HBM pad.
    batch2 = 300
    x2 = jax.random.normal(k_x2, (batch2, state_dim), jnp.float32)
    ref2 = reference_forward(x2, params)
    out2 = jax.block_until_ready(critic_forward(x2, params))
    assert out2.shape == (batch2, 1)
    assert jnp.allclose(out2, ref2, atol=1e-3, rtol=1e-3)

    print("KERNEL_OK")
</pallas_src>

<mosaic_0001>
module attributes {stable_mosaic.version = 11 : i64} {
  func.func @critic_kernel(%arg0: i32, %arg1: memref<8x32xf32, #tpu.memory_space<vmem>>, %arg2: memref<32x128xf32, #tpu.memory_space<vmem>>, %arg3: memref<1x128xf32, #tpu.memory_space<vmem>>, %arg4: memref<128x128xf32, #tpu.memory_space<vmem>>, %arg5: memref<1x128xf32, #tpu.memory_space<vmem>>, %arg6: memref<1x128xf32, #tpu.memory_space<vmem>>, %arg7: memref<1x1xf32, #tpu.memory_space<smem>>, %arg8: memref<1x8xf32, #tpu.memory_space<vmem>>) attributes {dimension_semantics = [#tpu.dimension_semantics<parallel>], iteration_bounds = array<i64: 1>, scalar_prefetch = 0 : i64, scratch_operands = 0 : i64, tpu.core_type = #tpu.core_type<tc>, window_params = [{transform_indices = @transform_0, window_bounds = array<i64: 8, 32>}, {pipeline_mode = #tpu.pipeline_mode<synchronous>, transform_indices = @transform_1, window_bounds = array<i64: 32, 128>}, {pipeline_mode = #tpu.pipeline_mode<synchronous>, transform_indices = @transform_2, window_bounds = array<i64: 1, 128>}, {pipeline_mode = #tpu.pipeline_mode<synchronous>, transform_indices = @transform_3, window_bounds = array<i64: 128, 128>}, {pipeline_mode = #tpu.pipeline_mode<synchronous>, transform_indices = @transform_4, window_bounds = array<i64: 1, 128>}, {pipeline_mode = #tpu.pipeline_mode<synchronous>, transform_indices = @transform_5, window_bounds = array<i64: 1, 128>}, {transform_indices = @transform_6, window_bounds = array<i64: 1, 1>}, {transform_indices = @transform_7, window_bounds = array<i64: 1, 8>}]} {
    %c0 = arith.constant 0 : index
    %c0_0 = arith.constant 0 : index
    %0 = vector.load %arg1[%c0, %c0_0] : memref<8x32xf32, #tpu.memory_space<vmem>>, vector<8x32xf32>
    %c0_1 = arith.constant 0 : index
    %c0_2 = arith.constant 0 : index
    %1 = vector.load %arg2[%c0_1, %c0_2] : memref<32x128xf32, #tpu.memory_space<vmem>>, vector<32x128xf32>
    %cst = arith.constant dense<0.000000e+00> : vector<8x128xf32>
    %2 = tpu.matmul %0, %1, %cst {dimension_numbers = #tpu.dot_dimension_numbers<[1], [0], [0], [1], [0, 0, 1, 1], [], []>} : vector<8x32xf32>, vector<32x128xf32>, vector<8x128xf32> -> vector<8x128xf32>
    %c0_3 = arith.constant 0 : index
    %c0_4 = arith.constant 0 : index
    %3 = vector.load %arg3[%c0_3, %c0_4] : memref<1x128xf32, #tpu.memory_space<vmem>>, vector<1x128xf32>
    %4 = vector.broadcast %3 : vector<1x128xf32> to vector<8x128xf32>
    %5 = arith.addf %2, %4 : vector<8x128xf32>
    %cst_5 = arith.constant 0.000000e+00 : f32
    %6 = vector.broadcast %cst_5 : f32 to vector<8x128xf32>
    %7 = arith.maximumf %5, %6 : vector<8x128xf32>
    %c0_6 = arith.constant 0 : index
    %c0_7 = arith.constant 0 : index
    %8 = vector.load %arg4[%c0_6, %c0_7] : memref<128x128xf32, #tpu.memory_space<vmem>>, vector<128x128xf32>
    %cst_8 = arith.constant dense<0.000000e+00> : vector<8x128xf32>
    %9 = tpu.matmul %7, %8, %cst_8 {dimension_numbers = #tpu.dot_dimension_numbers<[1], [0], [0], [1], [0, 0, 1, 1], [], []>} : vector<8x128xf32>, vector<128x128xf32>, vector<8x128xf32> -> vector<8x128xf32>
    %c0_9 = arith.constant 0 : index
    %c0_10 = arith.constant 0 : index
    %10 = vector.load %arg5[%c0_9, %c0_10] : memref<1x128xf32, #tpu.memory_space<vmem>>, vector<1x128xf32>
    %11 = vector.broadcast %10 : vector<1x128xf32> to vector<8x128xf32>
    %12 = arith.addf %9, %11 : vector<8x128xf32>
    %cst_11 = arith.constant 0.000000e+00 : f32
    %13 = vector.broadcast %cst_11 : f32 to vector<8x128xf32>
    %14 = arith.maximumf %12, %13 : vector<8x128xf32>
    %c0_12 = arith.constant 0 : index
    %c0_13 = arith.constant 0 : index
    %15 = vector.load %arg6[%c0_12, %c0_13] : memref<1x128xf32, #tpu.memory_space<vmem>>, vector<1x128xf32>
    %cst_14 = arith.constant dense<0.000000e+00> : vector<1x8xf32>
    %16 = tpu.matmul %15, %14, %cst_14 {dimension_numbers = #tpu.dot_dimension_numbers<[1], [1], [0], [0], [0, 0, 1, 0], [], []>} : vector<1x128xf32>, vector<8x128xf32>, vector<1x8xf32> -> vector<1x8xf32>
    %c0_15 = arith.constant 0 : index
    %c0_16 = arith.constant 0 : index
    %17 = memref.load %arg7[%c0_15, %c0_16] : memref<1x1xf32, #tpu.memory_space<smem>>
    %18 = vector.broadcast %17 : f32 to vector<1x8xf32>
    %19 = arith.addf %16, %18 : vector<1x8xf32>
    %c0_17 = arith.constant 0 : index
    %c0_18 = arith.constant 0 : index
    %20 = vector.load %arg8[%c0_17, %c0_18] : memref<1x8xf32, #tpu.memory_space<vmem>>, vector<1x8xf32>
    tpu.vector_store %arg8[%c0_17, %c0_18], %19 {strides = array<i32>} : memref<1x8xf32, #tpu.memory_space<vmem>>, vector<1x8xf32>,
    return
  }
  func.func @transform_0(%arg0: i32) -> (i32, i32) {
    %c0_i32 = arith.constant 0 : i32
    %c0_i32_0 = arith.constant 0 : i32
    return %arg0, %c0_i32 : i32, i32
  }
  func.func @transform_1(%arg0: i32) -> (i32, i32) {
    %c0_i32 = arith.constant 0 : i32
    %c0_i32_0 = arith.constant 0 : i32
    %c0_i32_1 = arith.constant 0 : i32
    return %c0_i32, %c0_i32_0 : i32, i32
  }
  func.func @transform_2(%arg0: i32) -> (i32, i32) {
    %c0_i32 = arith.constant 0 : i32
    %c0_i32_0 = arith.constant 0 : i32
    %c0_i32_1 = arith.constant 0 : i32
    return %c0_i32, %c0_i32_0 : i32, i32
  }
  func.func @transform_3(%arg0: i32) -> (i32, i32) {
    %c0_i32 = arith.constant 0 : i32
    %c0_i32_0 = arith.constant 0 : i32
    %c0_i32_1 = arith.constant 0 : i32
    return %c0_i32, %c0_i32_0 : i32, i32
  }
  func.func @transform_4(%arg0: i32) -> (i32, i32) {
    %c0_i32 = arith.constant 0 : i32
    %c0_i32_0 = arith.constant 0 : i32
    %c0_i32_1 = arith.constant 0 : i32
    return %c0_i32, %c0_i32_0 : i32, i32
  }
  func.func @transform_5(%arg0: i32) -> (i32, i32) {
    %c0_i32 = arith.constant 0 : i32
    %c0_i32_0 = arith.constant 0 : i32
    %c0_i32_1 = arith.constant 0 : i32
    return %c0_i32, %c0_i32_0 : i32, i32
  }
  func.func @transform_6(%arg0: i32) -> (i32, i32) {
    %c0_i32 = arith.constant 0 : i32
    %c0_i32_0 = arith.constant 0 : i32
    %c0_i32_1 = arith.constant 0 : i32
    return %c0_i32, %c0_i32_0 : i32, i32
  }
  func.func @transform_7(%arg0: i32) -> (i32, i32) {
    %c0_i32 = arith.constant 0 : i32
    %c0_i32_0 = arith.constant 0 : i32
    return %c0_i32, %arg0 : i32, i32
  }
}

</mosaic_0001>

<bundles_post_ra>
// kernel: tpu_custom_call.1
= control target key start
LH: loop header
LB: loop body
LE: loop exit
PB: predicated region body
PF: predicated region fallthrough
CT: control target
= control target key end

     0   :  { %13 = vsyncpa [#allocation4], 0  ;;  %s668_s0 = inlined_call_operand.hbm [shape: f32[8,32], index: 0, kind: input, shape index: {}]   ;;  %s669_s1 = inlined_call_operand.hbm [shape: f32[32,128], index: 1, kind: input, shape index: {}]   ;;  %s670_s2 = inlined_call_operand.vmem [shape: f32[1,128], index: 2, kind: input, shape index: {}]   ;;  %s671_s3 = inlined_call_operand.hbm [shape: f32[128,128], index: 3, kind: input, shape index: {}]   ;;  %s672_s4 = inlined_call_operand.vmem [shape: f32[1,128], index: 4, kind: input, shape index: {}]   ;;  %s673_s5 = inlined_call_operand.vmem [shape: f32[1,128], index: 5, kind: input, shape index: {}]   ;;  %s674_s6 = inlined_call_operand.<no memory space> [shape: f32[1,1], index: 6, kind: input, shape index: {}]   ;;  %s675_s7 = inlined_call_operand.hbm [shape: f32[1,8], index: 7, kind: output, shape index: {}]  }
   0x1   :  { %14 = vsyncpa [#allocation7], 0 }
   0x2   :  { %15 = vsyncpa [#allocation5], 0  ;;  %s550_s24 = smov [#allocation6]   ;;  %s456_s28 = scalar_lea.hbm %s669_s1, 512 }
   0x3   :  { %s31_s25 = sshll.u32 %s550_s24, 4  ;;  %p457_p0 = scmp.ne.s32.totalorder %s669_s1, %s456_s28  ;;  %s32_s25 = int_to_ptr.vmem [resolvable:$true] %s31_s25 }
   0x4   :  { %p460_p1 = scmp.lt.u32.totalorder %s456_s28, %s669_s1 }
   0x6   :  { %p462_p2 = pnand %p460_p1, %p457_p0 }
   0x8   :  { %465 = shalt.err (!%p462_p2)
}
   0x9   :  { %s466_s10 = scalar_lea.vmem %s32_s25, 512  ;;  %p471_p4 = scmp.lt.s32.totalorder %s32_s25, %s32_s25 }
   0xa   :  { %p467_p3 = scmp.ne.s32.totalorder %s32_s25, %s466_s10  ;;  %p472_p5 = scmp.lt.s32.totalorder %s466_s10, %s466_s10 }
   0xc   :  { %p473_p6 = por %p472_p5, %p471_p4 }
   0xe   :  { %p474_p7 = pnand %p473_p6, %p467_p3 }
  0x10   :  { %477 = shalt.err (!%p474_p7)
}
  0x11   :  { %s551_s11 = smov 128   ;;  %s552_s12 = smov 8  }
  0x12   :  { %37 = dma.hbm_to_vmem [thread:$0]  %s669_s1, 512, %s32_s25, [#allocation7], %s551_s11, %s551_s11, %s552_s12  }
  0x13   :  { %s553_s15 = smov [#allocation3]   ;;  %s554_s17 = smov [#allocation8]  }
  0x14   :  { %s22_s16 = sshll.u32 %s553_s15, 4  ;;  %s45_s18 = sshll.u32 %s554_s17, 4  ;;  %s23_s16 = int_to_ptr.vmem [resolvable:$true] %s22_s16  ;;  %s46_s18 = int_to_ptr.vmem [resolvable:$true] %s45_s18 }
  0x15   :  { %s478_s21 = scalar_lea.hbm %s668_s0, 128 }
  0x16   :  { %p479_p8 = scmp.ne.s32.totalorder %s668_s0, %s478_s21  ;;  %p482_p9 = scmp.lt.u32.totalorder %s478_s21, %s668_s0 }
  0x18   :  { %p484_p10 = pnand %p482_p9, %p479_p8 }
  0x1a   :  { %487 = shalt.err (!%p484_p10)
}
  0x1b   :  { %s488_s1 = scalar_lea.vmem %s23_s16, 128  ;;  %p493_p12 = scmp.lt.s32.totalorder %s23_s16, %s23_s16 }
  0x1c   :  { %p489_p11 = scmp.ne.s32.totalorder %s23_s16, %s488_s1  ;;  %p494_p13 = scmp.lt.s32.totalorder %s488_s1, %s488_s1 }
  0x1e   :  { %p495_p0 = por %p494_p13, %p493_p12 }
  0x20   :  { %p496_p1 = pnand %p495_p0, %p489_p11 }
  0x22   :  { %499 = shalt.err (!%p496_p1)
}
  0x23   :  { %25 = dma.hbm_to_vmem [thread:$0]  %s668_s0, 128, %s23_s16, [#allocation4]  }
  0x24   :  { %s500_s30 = scalar_lea.hbm %s671_s3, 2048 }
  0x25   :  { %p501_p2 = scmp.ne.s32.totalorder %s671_s3, %s500_s30  ;;  %p504_p3 = scmp.lt.u32.totalorder %s500_s30, %s671_s3 }
  0x27   :  { %p506_p4 = pnand %p504_p3, %p501_p2 }
  0x29   :  { %509 = shalt.err (!%p506_p4)
}
  0x2a   :  { %s510_s14 = scalar_lea.vmem %s46_s18, 2048  ;;  %p515_p6 = scmp.lt.s32.totalorder %s46_s18, %s46_s18 }
  0x2b   :  { %p511_p5 = scmp.ne.s32.totalorder %s46_s18, %s510_s14  ;;  %p516_p7 = scmp.lt.s32.totalorder %s510_s14, %s510_s14 }
  0x2d   :  { %p517_p8 = por %p516_p7, %p515_p6 }
  0x2f   :  { %p518_p9 = pnand %p517_p8, %p511_p5 }
  0x31   :  { %521 = shalt.err (!%p518_p9)
}
  0x32   :  { %51 = dma.hbm_to_vmem [thread:$0]  %s671_s3, 2048, %s46_s18, [#allocation7], %s551_s11, %s551_s11, %s552_s12  }
  0x33   :  { %544 = dma.done.wait [#allocation4], 128  }
  0x34   :  { %545 = vsyncadd [#allocation4], 4294967168 }
  0x35   :  { %546 = dma.done.wait [#allocation7], 2560  }
  0x36   :  { %547 = vsyncadd [#allocation7], 4294964736  ;;  %v555_v0 = vmov 0.0|0.0   ;;  %vm556_vm0 = vmmov 0   ;;  %v557_v1 = vmov 0.0   ;;  %v68_v2 = vld [vmem:[#allocation6] sm:$0xff]  ;;  %v250_v44 = vstv %s674_s6 }
  0x37   :  { %417 = vmatprep.subr.bf16.mxu0 %v555_v0  ;;  %374 = vmatprep.mubr.msk.f32.mxu0 %vm556_vm0, %v557_v1  ;;  %v69_v3 = vld [vmem:[#allocation6 + $0x8] sm:$0xff]  ;;  %v70_v4 = vld [vmem:[#allocation6 + $0x10] sm:$0xff]  ;;  %v71_v6 = vld [vmem:[#allocation6 + $0x18] sm:$0xff]  ;;  %vm79_vm1 = vcmask 261120   ;;  %s558_s20 = smov [#allocation9]   ;;  %vm321_vm2 = vcmask 57344  }
  0x38   :  { %423 = vmatprep.subr.bf16.mxu1 %v555_v0  ;;  %409 = vmatprep.mubr.msk.f32.mxu1 %vm556_vm0, %v557_v1  ;;  %v418_v5 = vpack.c.bf16 %v69_v3, %v68_v2  ;;  %v154_v7 = vld [vmem:[#allocation8] sm:$0xff]  ;;  %v155_v8 = vld [vmem:[#allocation8 + $0x8] sm:$0xff]  ;;  %v156_v9 = vld [vmem:[#allocation8 + $0x10] sm:$0xff]  ;;  %v421_v11 = vpack.c.bf16 %v71_v6, %v70_v4  ;;  %s329_s21 = sshll.u32 %s558_s20, 4  ;;  %s330_s21 = int_to_ptr.vmem [resolvable:$true] %s329_s21 }
  0x39   :  { %v157_v10 = vld [vmem:[#allocation8 + $0x18] sm:$0xff]  ;;  %v424_v12 = vpack.c.bf16 %v155_v8, %v154_v7  ;;  %v158_v14 = vld [vmem:[#allocation8 + $0x20] sm:$0xff]  ;;  %v159_v15 = vld [vmem:[#allocation8 + $0x28] sm:$0xff]  ;;  %s526_s22 = scalar_lea.vmem %s330_s21, 32  ;;  %p527_p11 = scmp.lt.s32.totalorder %s330_s21, %s330_s21 }
  0x3a   :  { %419 = vmatpush3.bf16.msra.mxu0 %v418_v5  ;;  %v427_v13 = vpack.c.bf16 %v157_v10, %v156_v9  ;;  %v67_v16 = vld [vmem:[#allocation3] sm:$0xff]  ;;  %v430_v17 = vpack.c.bf16 %v159_v15, %v158_v14  ;;  %v160_v18 = vld [vmem:[#allocation8 + $0x30] sm:$0xff]  ;;  %v162_v21 = vld [vmem:[#allocation8 + $0x40] sm:$0xff] }
  0x3b   :  { %420 = vmatprep.subr.bf16.mxu0 %v555_v0  ;;  %425 = vmatpush3.bf16.msra.mxu1 %v424_v12  ;;  %v161_v19 = vld [vmem:[#allocation8 + $0x38] sm:$0xff]  ;;  %v163_v22 = vld [vmem:[#allocation8 + $0x48] sm:$0xff]  ;;  %v164_v24 = vld [vmem:[#allocation8 + $0x50] sm:$0xff] }
  0x3c   :  { %426 = vmatprep.subr.bf16.mxu1 %v555_v0  ;;  %v433_v20 = vpack.c.bf16 %v161_v19, %v160_v18  ;;  %v436_v23 = vpack.c.bf16 %v163_v22, %v162_v21  ;;  %v165_v25 = vld [vmem:[#allocation8 + $0x58] sm:$0xff]  ;;  %v166_v27 = vld [vmem:[#allocation8 + $0x60] sm:$0xff]  ;;  %v167_v28 = vld [vmem:[#allocation8 + $0x68] sm:$0xff] }
  0x3d   :  { %v439_v26 = vpack.c.bf16 %v165_v25, %v164_v24  ;;  %v442_v29 = vpack.c.bf16 %v167_v28, %v166_v27  ;;  %v168_v30 = vld [vmem:[#allocation8 + $0x70] sm:$0xff]  ;;  %v169_v31 = vld [vmem:[#allocation8 + $0x78] sm:$0xff] }
  0x3e   :  { %422 = vmatpush3.bf16.msra.mxu0 %v421_v11  ;;  %v445_v32 = vpack.c.bf16 %v169_v31, %v168_v30  ;;  %v339_v33 = vld [vmem:[%s670_s2] ss:$0 sm:$0xff] }
  0x3f   :  { %412 = vmatprep.subr.mxu0 %v557_v1  ;;  %428 = vmatpush3.bf16.msra.mxu1 %v427_v13  ;;  %v341_v38 = vld [vmem:[%s672_s4] ss:$0 sm:$0xff]  ;;  %s522_s4 = scalar_lea.vmem %s330_s21, 16 }
  0x40   :  { %429 = vmatprep.subr.bf16.mxu1 %v555_v0  ;;  %v248_v43 = vld [vmem:[%s673_s5] sm:$0x1]  ;;  %p523_p10 = scmp.ne.s32.totalorder %s330_s21, %s522_s4  ;;  %p528_p12 = scmp.lt.s32.totalorder %s526_s22, %s522_s4 }
  0x41   :  { %375 = vmatmul.mubr.msk.f32.vlgmr.msra.gmra.mrb[0].mxu0 %vm79_vm1, %v67_v16 }
  0x42   :  { %414 = vmatprep.mubr.msk.f32.mxu0 %vm556_vm0, %v557_v1  ;;  %p529_p13 = por %p528_p12, %p527_p11 }
  0x43   :  { %431 = vmatpush3.bf16.msra.mxu1 %v430_v17 }
  0x44   :  { %432 = vmatprep.subr.bf16.mxu1 %v555_v0  ;;  %p530_p0 = pnand %p529_p13, %p523_p10 }
  0x47   :  { %434 = vmatpush3.bf16.msra.mxu1 %v433_v20 }
  0x48   :  { %435 = vmatprep.subr.bf16.mxu1 %v555_v0 }
  0x4b   :  { %437 = vmatpush3.bf16.msra.mxu1 %v436_v23 }
  0x4c   :  { %438 = vmatprep.subr.bf16.mxu1 %v555_v0 }
  0x4f   :  { %440 = vmatpush3.bf16.msra.mxu1 %v439_v26 }
  0x50   :  { %441 = vmatprep.subr.bf16.mxu1 %v555_v0 }
  0x53   :  { %443 = vmatpush3.bf16.msra.mxu1 %v442_v29 }
  0x54   :  { %444 = vmatprep.subr.bf16.mxu1 %v555_v0 }
  0x57   :  { %446 = vmatpush3.bf16.msra.mxu1 %v445_v32 }
 0x114   :  { %v149_v34 = vpop.f32.mrb[0].mxu0 }
 0x115   :  { %v150_v35 = vadd.f32 %v339_v33, %v149_v34  ;;  %v376_v36 = vpop.f32.mrb[1].mxu0 }
 0x117   :  { %v153_v37 = vmax.f32 %v150_v35, 0.0 }
 0x119   :  { %410 = vmatmul.mubr.f32.vlgmr.msra.gmra.mrb[0].mxu1 %v153_v37 }
 0x1ec   :  { %v243_v39 = vpop.f32.mrb[0].mxu1 }
 0x1ed   :  { %v244_v40 = vadd.f32 %v341_v38, %v243_v39  ;;  %v411_v41 = vpop.f32.mrb[1].mxu1 }
 0x1ef   :  { %v247_v42 = vmax.f32 %v244_v40, 0.0 }
 0x1f1   :  { %413 = vmatpush3.xpose.msra.mxu0 %v247_v42 }
 0x1f4   :  { %415 = vmatmul.mubr.f32.vlgmr.msra.gmra.mrb[2].mxu0 %v248_v43 }
 0x2c7   :  { %v317_v45 = vpop.f32.mrb[2].mxu0 }
 0x2c8   :  { %v318_v46 = vadd.f32 %v317_v45, %v250_v44  ;;  %v416_v47 = vpop.f32.mrb[3].mxu0 }
 0x2ca   :  { %322 = vst.msk [vmem:[#allocation9] sm:$0x1] %vm321_vm2, %v318_v46 }
 0x2cb   :  { %533 = shalt.err (!%p530_p0)
}
 0x2cc   :  { %s534_s6 = scalar_lea.hbm %s675_s7, 16 }
 0x2cd   :  { %p535_p1 = scmp.ne.s32.totalorder %s675_s7, %s534_s6  ;;  %p538_p2 = scmp.lt.u32.totalorder %s534_s6, %s675_s7 }
 0x2cf   :  { %p540_p3 = pnand %p538_p2, %p535_p1 }
 0x2d1   :  { %543 = shalt.err (!%p540_p3)
}
 0x2d2   :  { %332 = dma.vmem_to_hbm [thread:$0]  %s330_s21, 16, %s675_s7, [#allocation5]  }
 0x2d3   :  { %548 = dma.done.wait [#allocation5], 16  }
 0x2d4   :  { %549 = vsyncadd [#allocation5], 4294967280 }
 0x2d5   :  { %336 = vsyncpa [#allocation4], 1 }
 0x2d6   :  { %337 = vsyncpa [#allocation7], 1 }
 0x2d7   :  { %338 = vsyncpa [#allocation5], 1 }

</bundles_post_ra>
